<compile_context>
chip_gen: v5e
topology: v5e:2x2
jax: 0.10.0
libtpu: 0.0.40
codegen_flags: <defaults>
</compile_context>

<pallas_src>
import jax
import jax.numpy as jnp
from jax import lax
from jax.experimental import pallas as pl
from jax.experimental.pallas import tpu as pltpu

# ---- model constants (from the PyTorch module) ----------------------------------------
HEIGHT, WIDTH = 198, 39          # x.view((-1, 1, 1, 198, 39))
CHANNELS = 1
HIDDEN = 64
NUM_CLASSES = 4
KH = KW = 3
CIN = CHANNELS + HIDDEN          # conv input = cat([x, h_prev]) -> 65 channels (h_prev is zero)
HW = HEIGHT * WIDTH              # 7722 spatial positions

# ---- derived tail geometry --------------------------------------------------------------
ROWS = 64                                 # consumed spatial positions: HW-64 .. HW-1
START = HW - ROWS                         # 7658
H0, W0 = START // WIDTH, START % WIDTH    # (196, 14)
N_TOP = WIDTH - W0                        # 25 positions on image row 196
N_BOT = ROWS - N_TOP                      # 39 positions on image row 197
assert H0 == HEIGHT - 2 and N_BOT == WIDTH   # tail spans exactly the last two image rows

K_TAPS = KH * KW                          # 9 real im2col taps (single input channel)
K_PAD = 128                               # lane-aligned contraction (lane 9 = constant 1 -> bias)
N_PAD = 128                               # lane-aligned gate columns (only cols 0..2 are live)


# ---- Pallas kernel -----------------------------------------------------------------------
def convlstm_tail_kernel(x_ref, w_ref, h_ref):
    """Fused gate matmul + LSTM gating for a tile of folded (sample, position) rows.

    x_ref: (TILE_M, K_PAD) f32  im2col rows (lane 9 == 1.0 carries the conv bias)
    w_ref: (K_PAD, N_PAD)  f32  cols 0,1,2 = conv weights+bias for gate columns (i63, o63, g63)
    h_ref: (TILE_M, 1)     f32  h_next of hidden channel 63 for these rows
    """
    gates = jnp.dot(x_ref[...], w_ref[...], preferred_element_type=jnp.float32)
    io = jax.nn.sigmoid(gates[:, 0:2])      # lanes 0,1 -> i, o gates (one EUP pass)
    g = jnp.tanh(gates[:, 2:3])             # lane 2    -> g gate
    c = io[:, 0:1] * g                      # f * c_prev == 0 because c_prev == 0
    h_ref[...] = io[:, 1:2] * jnp.tanh(c)


# ---- wrapper helpers ---------------------------------------------------------------------
def _tail_im2col(x_img):
    """(B, H, W) f32 -> (B*ROWS, K_PAD) f32 im2col of the last ROWS positions.

    Uses only static slices of the bottom 3 image rows (no gather HLOs).  Lane 9 is the
    constant-1 bias lane; lanes 10..127 are zero K-padding.
    """
    B = x_img.shape[0]
    strip = x_img[:, HEIGHT - 3:, :]                       # image rows 195..197   (B, 3, 39)
    sp = jnp.pad(strip, ((0, 0), (0, 1), (1, 1)))          # +zero row 198, +width pad (B, 4, 41)
    taps = []
    for kh in range(KH):
        for kw in range(KW):
            top = sp[:, kh, W0 + kw: W0 + kw + N_TOP]      # outputs (196, 14..38)  (B, 25)
            bot = sp[:, kh + 1, kw: kw + N_BOT]            # outputs (197,  0..38)  (B, 39)
            taps.append(jnp.concatenate([top, bot], axis=1))            # (B, 64)
    m = jnp.stack(taps, axis=-1)                                        # (B, 64, 9)
    ones = jnp.ones((B, ROWS, 1), x_img.dtype)                          # bias lane
    zeros = jnp.zeros((B, ROWS, K_PAD - K_TAPS - 1), x_img.dtype)
    return jnp.concatenate([m, ones, zeros], axis=-1).reshape(B * ROWS, K_PAD)


def _gate_weight_matrix(conv_w, conv_b):
    """(K_PAD, N_PAD) f32: cols 0..2 = 9 taps of gate columns {i63, o63, g63}; row 9 = bias."""
    cols = (HIDDEN - 1, 3 * HIDDEN - 1, 4 * HIDDEN - 1)    # 63 (i), 191 (o), 255 (g)
    w = jnp.stack([conv_w[c, 0] for c in cols], axis=-1).reshape(K_TAPS, 3)   # [kh*3+kw, gate]
    b = jnp.stack([conv_b[c] for c in cols])[None, :]                          # (1, 3)
    wb = jnp.concatenate(
        [w, b, jnp.zeros((K_PAD - K_TAPS - 1, 3), conv_w.dtype)], axis=0)      # (128, 3)
    return jnp.pad(wb, ((0, 0), (0, N_PAD - 3))).astype(jnp.float32)           # (128, 128)


# ---- forward -----------------------------------------------------------------------------
@jax.jit
def my_convlstm_forward(x, conv_w, conv_b, lin_w, lin_b):
    """Reproduces MyConvLSTM.forward.  Returns (B, NUM_CLASSES) float32."""
    B = x.size // HW
    x_img = x.reshape(B, HEIGHT, WIDTH).astype(jnp.float32)

    xcol = _tail_im2col(x_img)                       # (B*64, 128) f32
    w = _gate_weight_matrix(conv_w, conv_b)          # (128, 128)  f32

    M = B * ROWS                                     # folded M dimension (multiple of 64)
    if M <= 256:
        tile_m = M                                   # single grid step for small batches
    elif M <= 1024:
        tile_m = 256                                 # >=2 parallel tiles -> both v7x TensorCores
    else:
        tile_m = 512                                 # amortize ~0.35us/step for large batches
    num_tiles = pl.cdiv(M, tile_m)
    m_pad = num_tiles * tile_m
    if m_pad != M:
        xcol = jnp.pad(xcol, ((0, m_pad - M), (0, 0)))

    h_col = pl.pallas_call(
        convlstm_tail_kernel,
        out_shape=jax.ShapeDtypeStruct((m_pad, 1), jnp.float32),
        grid=(num_tiles,),
        in_specs=[
            pl.BlockSpec((tile_m, K_PAD), lambda i: (i, 0)),
            pl.BlockSpec((K_PAD, N_PAD), lambda i: (0, 0)),   # weights resident across steps
        ],
        out_specs=pl.BlockSpec((tile_m, 1), lambda i: (i, 0)),
        compiler_params=pltpu.CompilerParams(dimension_semantics=("parallel",)),
    )(xcol, w)

    v = h_col[:M, 0].reshape(B, ROWS)                # == r_out.view(B,-1,64)[:, -1, :]
    return v @ lin_w.T + lin_b[None, :]              # Linear(64, 4): a few hundred FLOPs -> jnp


# ---- pure-JAX reference (full ConvLSTM cell, for verification) ---------------------------
def reference_forward(x, conv_w, conv_b, lin_w, lin_b):
    B = x.size // HW
    x_t = x.reshape(B, 1, HEIGHT, WIDTH).astype(jnp.float32)
    combined = jnp.concatenate(
        [x_t, jnp.zeros((B, HIDDEN, HEIGHT, WIDTH), jnp.float32)], axis=1)
    gates = lax.conv_general_dilated(
        combined, conv_w, (1, 1), "SAME",
        dimension_numbers=("NCHW", "OIHW", "NCHW")) + conv_b[None, :, None, None]
    i = jax.nn.sigmoid(gates[:, 0 * HIDDEN:1 * HIDDEN])
    f = jax.nn.sigmoid(gates[:, 1 * HIDDEN:2 * HIDDEN])
    o = jax.nn.sigmoid(gates[:, 2 * HIDDEN:3 * HIDDEN])
    g = jnp.tanh(gates[:, 3 * HIDDEN:4 * HIDDEN])
    c = f * 0.0 + i * g                              # c_prev == 0
    h = o * jnp.tanh(c)                              # (B, 64, H, W)
    v = h.reshape(B, -1)[:, -ROWS:]
    return v @ lin_w.T + lin_b


if __name__ == "__main__":
    # deterministic synthetic parameters / input (shapes implied by the PyTorch __init__)
    k0, k1, k2, k3, k4 = jax.random.split(jax.random.PRNGKey(0), 5)
    conv_w = jax.random.normal(k1, (4 * HIDDEN, CIN, KH, KW), jnp.float32) * 0.05
    conv_b = jax.random.normal(k2, (4 * HIDDEN,), jnp.float32) * 0.05
    lin_w = jax.random.normal(k3, (NUM_CLASSES, HIDDEN), jnp.float32) * 0.1
    lin_b = jax.random.normal(k4, (NUM_CLASSES,), jnp.float32) * 0.1

    x = jax.random.normal(k0, (2, HEIGHT, WIDTH), jnp.float32)   # batch of 2 frames (198, 39)

    out = jax.block_until_ready(my_convlstm_forward(x, conv_w, conv_b, lin_w, lin_b))
    ref = reference_forward(x, conv_w, conv_b, lin_w, lin_b)

    ok = (out.shape == (2, NUM_CLASSES)
          and bool(jnp.all(jnp.isfinite(out)))
          and bool(jnp.allclose(out, ref, atol=1e-2, rtol=1e-2)))
    if ok:
        print("KERNEL_OK")
    else:
        print("MISMATCH", out, ref)
</pallas_src>

<mosaic_0001>
module attributes {stable_mosaic.version = 11 : i64} {
  func.func @convlstm_tail_kernel(%arg0: i32, %arg1: memref<128x128xf32, #tpu.memory_space<vmem>>, %arg2: memref<128x128xf32, #tpu.memory_space<vmem>>, %arg3: memref<128x1xf32, #tpu.memory_space<vmem>>) attributes {dimension_semantics = [#tpu.dimension_semantics<parallel>], iteration_bounds = array<i64: 1>, scalar_prefetch = 0 : i64, scratch_operands = 0 : i64, tpu.core_type = #tpu.core_type<tc>, window_params = [{transform_indices = @transform_0, window_bounds = array<i64: 128, 128>}, {pipeline_mode = #tpu.pipeline_mode<synchronous>, transform_indices = @transform_1, window_bounds = array<i64: 128, 128>}, {transform_indices = @transform_2, window_bounds = array<i64: 128, 1>}]} {
    %c0 = arith.constant 0 : index
    %c0_0 = arith.constant 0 : index
    %0 = vector.load %arg1[%c0, %c0_0] : memref<128x128xf32, #tpu.memory_space<vmem>>, vector<128x128xf32>
    %c0_1 = arith.constant 0 : index
    %c0_2 = arith.constant 0 : index
    %1 = vector.load %arg2[%c0_1, %c0_2] : memref<128x128xf32, #tpu.memory_space<vmem>>, vector<128x128xf32>
    %cst = arith.constant dense<0.000000e+00> : vector<128x128xf32>
    %2 = tpu.matmul %0, %1, %cst {dimension_numbers = #tpu.dot_dimension_numbers<[1], [0], [0], [1], [0, 0, 1, 1], [], []>} : vector<128x128xf32>, vector<128x128xf32>, vector<128x128xf32> -> vector<128x128xf32>
    %3 = vector.extract_strided_slice %2 {offsets = [0, 0], sizes = [128, 2], strides = [1, 1]} : vector<128x128xf32> to vector<128x2xf32>
    %4 = arith.negf %3 : vector<128x2xf32>
    %5 = math.exp %4 : vector<128x2xf32>
    %cst_3 = arith.constant 1.000000e+00 : f32
    %6 = vector.broadcast %cst_3 : f32 to vector<128x2xf32>
    %7 = arith.addf %6, %5 : vector<128x2xf32>
    %8 = arith.divf %6, %7 : vector<128x2xf32>
    %9 = vector.extract_strided_slice %2 {offsets = [0, 2], sizes = [128, 1], strides = [1, 1]} : vector<128x128xf32> to vector<128x1xf32>
    %10 = math.tanh %9 : vector<128x1xf32>
    %11 = vector.extract_strided_slice %8 {offsets = [0, 0], sizes = [128, 1], strides = [1, 1]} : vector<128x2xf32> to vector<128x1xf32>
    %12 = arith.mulf %11, %10 : vector<128x1xf32>
    %13 = vector.extract_strided_slice %8 {offsets = [0, 1], sizes = [128, 1], strides = [1, 1]} : vector<128x2xf32> to vector<128x1xf32>
    %14 = math.tanh %12 : vector<128x1xf32>
    %15 = arith.mulf %13, %14 : vector<128x1xf32>
    %c0_4 = arith.constant 0 : index
    %c0_5 = arith.constant 0 : index
    %16 = vector.load %arg3[%c0_4, %c0_5] : memref<128x1xf32, #tpu.memory_space<vmem>>, vector<128x1xf32>
    tpu.vector_store %arg3[%c0_4, %c0_5], %15 {strides = array<i32>} : memref<128x1xf32, #tpu.memory_space<vmem>>, vector<128x1xf32>,
    return
  }
  func.func @transform_0(%arg0: i32) -> (i32, i32) {
    %c0_i32 = arith.constant 0 : i32
    %c0_i32_0 = arith.constant 0 : i32
    return %arg0, %c0_i32 : i32, i32
  }
  func.func @transform_1(%arg0: i32) -> (i32, i32) {
    %c0_i32 = arith.constant 0 : i32
    %c0_i32_0 = arith.constant 0 : i32
    %c0_i32_1 = arith.constant 0 : i32
    return %c0_i32, %c0_i32_0 : i32, i32
  }
  func.func @transform_2(%arg0: i32) -> (i32, i32) {
    %c0_i32 = arith.constant 0 : i32
    %c0_i32_0 = arith.constant 0 : i32
    return %arg0, %c0_i32 : i32, i32
  }
}

</mosaic_0001>

<bundles_post_ra>
// kernel: squeeze.43
= control target key start
LH: loop header
LB: loop body
LE: loop exit
PB: predicated region body
PF: predicated region fallthrough
CT: control target
= control target key end

     0   :  { %vm18_vm0 = vcmask 523264   ;;  %s51_s0 = inlined_call_operand.vmem [shape: bf16[128], index: 0, kind: input, shape index: {}]   ;;  %s52_s1 = inlined_call_operand.vmem [shape: bf16[2,64], index: 1, kind: output, shape index: {}]  }
   0x1   :  { %v13_v0 = vld [vmem:[%s51_s0] sm:$0x1]  ;;  %s34_s0 = smov 64  }
   0x2   :  { %v14_v1 = vunpack.c.l.bf16 %v13_v0 }
   0x4   :  { %16 = vst [vmem:[#allocation1] sm:$0x3] %v14_v1 }
   0xb   :  { %v20_v2 = vld [vmem:[#allocation1] sm:$0x1]  }
   0xc   :  { %v17_v3 = vld [vmem:[#allocation1] sm:$0x1]   ;;  %21 = vrot.lane.b32.xlu0 %v20_v2, %s34_s0 }
   0xd   :  { %19 = vst.msk [vmem:[#allocation0] sm:$0x1] %vm18_vm0, %v17_v3  }
  0x7e   :  { %v22_v4 = vpop.permute.xlu0 %21  }
  0x7f   :  { %25 = vst.msk [vmem:[#allocation0 + $0x1] sm:$0x1] %vm18_vm0, %v22_v4  }
  0x86   :  { %v28_v5 = vld [vmem:[#allocation0] sm:$0x3] }
  0x87   :  { %v29_v6 = vpack.c.bf16 0.0, %v28_v5 }
  0x89   :  { %32 = vst [vmem:[%s52_s1] sm:$0x1] %v29_v6 }

// kernel: my_convlstm_forward.1
= control target key start
LH: loop header
LB: loop body
LE: loop exit
PB: predicated region body
PF: predicated region fallthrough
CT: control target
= control target key end

     0   :  { %s884_s16 = smov 126   ;;  %s886_s17 = smov 127   ;;  %s1597_s1 = inlined_call_operand.vmem [shape: f32[128,128], index: 1, kind: input, shape index: {}]   ;;  %s1598_s0 = inlined_call_operand.vmem [shape: f32[128,128], index: 0, kind: input, shape index: {}]   ;;  %s1599_s2 = inlined_call_operand.vmem [shape: f32[128,1], index: 2, kind: output, shape index: {}]  }
   0x1   :  { %v42_v0 = vld [vmem:[%s1597_s1 + $0x78] sm:$0xff]  ;;  %v41_v1 = vld [vmem:[%s1597_s1 + $0x70] sm:$0xff]  ;;  %v40_v2 = vld [vmem:[%s1597_s1 + $0x68] sm:$0xff] }
   0x2   :  { %43 = vmatpush.msra.mxu0 %v42_v0  ;;  %705 = vmatpush.msra.mxu1 %v42_v0  ;;  %v39_v3 = vld [vmem:[%s1597_s1 + $0x60] sm:$0xff]  ;;  %v38_v4 = vld [vmem:[%s1597_s1 + $0x58] sm:$0xff]  ;;  %v37_v5 = vld [vmem:[%s1597_s1 + $0x50] sm:$0xff] }
   0x3   :  { %706 = vmatpush.msra.mxu2 %v42_v0  ;;  %707 = vmatpush.msra.mxu3 %v42_v0  ;;  %v36_v6 = vld [vmem:[%s1597_s1 + $0x48] sm:$0xff]  ;;  %v35_v7 = vld [vmem:[%s1597_s1 + $0x40] sm:$0xff]  ;;  %v34_v8 = vld [vmem:[%s1597_s1 + $0x38] sm:$0xff] }
   0x4   :  { %44 = vmatpush.msra.mxu0 %v41_v1  ;;  %708 = vmatpush.msra.mxu1 %v41_v1  ;;  %v33_v9 = vld [vmem:[%s1597_s1 + $0x30] sm:$0xff]  ;;  %v32_v10 = vld [vmem:[%s1597_s1 + $0x28] sm:$0xff]  ;;  %v31_v11 = vld [vmem:[%s1597_s1 + $0x20] sm:$0xff] }
   0x5   :  { %709 = vmatpush.msra.mxu2 %v41_v1  ;;  %710 = vmatpush.msra.mxu3 %v41_v1  ;;  %v30_v12 = vld [vmem:[%s1597_s1 + $0x18] sm:$0xff]  ;;  %v29_v13 = vld [vmem:[%s1597_s1 + $0x10] sm:$0xff]  ;;  %v28_v14 = vld [vmem:[%s1597_s1 + $0x8] sm:$0xff] }
   0x6   :  { %45 = vmatpush.msra.mxu0 %v40_v2  ;;  %711 = vmatpush.msra.mxu1 %v40_v2  ;;  %v27_v15 = vld [vmem:[%s1597_s1] sm:$0xff]  ;;  %v12_v20 = vld [vmem:[%s1598_s0 + $0x8] sm:$0xff]  ;;  %v13_v24 = vld [vmem:[%s1598_s0 + $0x10] sm:$0xff] }
   0x7   :  { %712 = vmatpush.msra.mxu2 %v40_v2  ;;  %713 = vmatpush.msra.mxu3 %v40_v2  ;;  %v11_v16 = vld [vmem:[%s1598_s0] sm:$0xff]  ;;  %v16_v21 = vld [vmem:[%s1598_s0 + $0x28] sm:$0xff]  ;;  %v17_v25 = vld [vmem:[%s1598_s0 + $0x30] sm:$0xff] }
   0x8   :  { %46 = vmatpush.msra.mxu0 %v39_v3  ;;  %714 = vmatpush.msra.mxu1 %v39_v3  ;;  %v15_v17 = vld [vmem:[%s1598_s0 + $0x20] sm:$0xff]  ;;  %v20_v22 = vld [vmem:[%s1598_s0 + $0x48] sm:$0xff]  ;;  %v21_v26 = vld [vmem:[%s1598_s0 + $0x50] sm:$0xff] }
   0x9   :  { %715 = vmatpush.msra.mxu2 %v39_v3  ;;  %716 = vmatpush.msra.mxu3 %v39_v3  ;;  %v19_v18 = vld [vmem:[%s1598_s0 + $0x40] sm:$0xff]  ;;  %v24_v23 = vld [vmem:[%s1598_s0 + $0x68] sm:$0xff]  ;;  %v25_v27 = vld [vmem:[%s1598_s0 + $0x70] sm:$0xff] }
   0xa   :  { %47 = vmatpush.msra.mxu0 %v38_v4  ;;  %717 = vmatpush.msra.mxu1 %v38_v4  ;;  %v23_v19 = vld [vmem:[%s1598_s0 + $0x60] sm:$0xff]  ;;  %v14_v28 = vld [vmem:[%s1598_s0 + $0x18] sm:$0xff] }
   0xb   :  { %718 = vmatpush.msra.mxu2 %v38_v4  ;;  %719 = vmatpush.msra.mxu3 %v38_v4  ;;  %v18_v29 = vld [vmem:[%s1598_s0 + $0x38] sm:$0xff] }
   0xc   :  { %48 = vmatpush.msra.mxu0 %v37_v5  ;;  %720 = vmatpush.msra.mxu1 %v37_v5  ;;  %v22_v30 = vld [vmem:[%s1598_s0 + $0x58] sm:$0xff] }
   0xd   :  { %721 = vmatpush.msra.mxu2 %v37_v5  ;;  %722 = vmatpush.msra.mxu3 %v37_v5  ;;  %v26_v31 = vld [vmem:[%s1598_s0 + $0x78] sm:$0xff]  ;;  %s885_s0 = smov 1  }
   0xe   :  { %49 = vmatpush.msra.mxu0 %v36_v6  ;;  %723 = vmatpush.msra.mxu1 %v36_v6 }
   0xf   :  { %724 = vmatpush.msra.mxu2 %v36_v6  ;;  %725 = vmatpush.msra.mxu3 %v36_v6 }
  0x10   :  { %50 = vmatpush.msra.mxu0 %v35_v7  ;;  %726 = vmatpush.msra.mxu1 %v35_v7 }
  0x11   :  { %727 = vmatpush.msra.mxu2 %v35_v7  ;;  %728 = vmatpush.msra.mxu3 %v35_v7 }
  0x12   :  { %51 = vmatpush.msra.mxu0 %v34_v8  ;;  %729 = vmatpush.msra.mxu1 %v34_v8 }
  0x13   :  { %730 = vmatpush.msra.mxu2 %v34_v8  ;;  %731 = vmatpush.msra.mxu3 %v34_v8 }
  0x14   :  { %52 = vmatpush.msra.mxu0 %v33_v9  ;;  %732 = vmatpush.msra.mxu1 %v33_v9 }
  0x15   :  { %733 = vmatpush.msra.mxu2 %v33_v9  ;;  %734 = vmatpush.msra.mxu3 %v33_v9 }
  0x16   :  { %53 = vmatpush.msra.mxu0 %v32_v10  ;;  %735 = vmatpush.msra.mxu1 %v32_v10 }
  0x17   :  { %736 = vmatpush.msra.mxu2 %v32_v10  ;;  %737 = vmatpush.msra.mxu3 %v32_v10 }
  0x18   :  { %54 = vmatpush.msra.mxu0 %v31_v11  ;;  %738 = vmatpush.msra.mxu1 %v31_v11 }
  0x19   :  { %739 = vmatpush.msra.mxu2 %v31_v11  ;;  %740 = vmatpush.msra.mxu3 %v31_v11 }
  0x1a   :  { %55 = vmatpush.msra.mxu0 %v30_v12  ;;  %741 = vmatpush.msra.mxu1 %v30_v12 }
  0x1b   :  { %742 = vmatpush.msra.mxu2 %v30_v12  ;;  %743 = vmatpush.msra.mxu3 %v30_v12 }
  0x1c   :  { %56 = vmatpush.msra.mxu0 %v29_v13  ;;  %744 = vmatpush.msra.mxu1 %v29_v13 }
  0x1d   :  { %745 = vmatpush.msra.mxu2 %v29_v13  ;;  %746 = vmatpush.msra.mxu3 %v29_v13 }
  0x1e   :  { %57 = vmatpush.msra.mxu0 %v28_v14  ;;  %747 = vmatpush.msra.mxu1 %v28_v14 }
  0x1f   :  { %748 = vmatpush.msra.mxu2 %v28_v14  ;;  %749 = vmatpush.msra.mxu3 %v28_v14 }
  0x20   :  { %58 = vmatpush.msra.mxu0 %v27_v15  ;;  %750 = vmatpush.msra.mxu1 %v27_v15 }
  0x21   :  { %751 = vmatpush.msra.mxu2 %v27_v15  ;;  %752 = vmatpush.msra.mxu3 %v27_v15 }
  0x22   :  { %59 = vmatmul.f32.vlgmr.msra.gmra.mxu0 %v11_v16  ;;  %71 = vmatmul.f32.vlgmr.msra.gmra.mxu1 %v15_v17 }
  0x23   :  { %83 = vmatmul.f32.vlgmr.msra.gmra.mxu2 %v19_v18  ;;  %95 = vmatmul.f32.vlgmr.msra.gmra.mxu3 %v23_v19 }
  0x2a   :  { %62 = vmatmul.f32.gmra.mxu0 %v12_v20  ;;  %74 = vmatmul.f32.gmra.mxu1 %v16_v21 }
  0x2b   :  { %86 = vmatmul.f32.gmra.mxu2 %v20_v22  ;;  %98 = vmatmul.f32.gmra.mxu3 %v24_v23 }
  0x32   :  { %65 = vmatmul.f32.gmra.mxu0 %v13_v24  ;;  %77 = vmatmul.f32.gmra.mxu1 %v17_v25 }
  0x33   :  { %89 = vmatmul.f32.gmra.mxu2 %v21_v26  ;;  %101 = vmatmul.f32.gmra.mxu3 %v25_v27 }
  0x3a   :  { %68 = vmatmul.f32.gmra.mxu0 %v14_v28  ;;  %80 = vmatmul.f32.gmra.mxu1 %v18_v29 }
  0x3b   :  { %92 = vmatmul.f32.gmra.mxu2 %v22_v30  ;;  %104 = vmatmul.f32.gmra.mxu3 %v26_v31 }
  0x9f   :  { %v998_v32 = vpop.f32.mrf.mxu0  ;;  %v72_v33 = vpop.f32.mrf.mxu1 }
  0xa0   :  { %756 = vtanh.f32 %v998_v32  ;;  %v693_v0 = vmul.f32 -1.442695, %v72_v33  ;;  %v689_v8 = vmul.f32 -1.442695, %v998_v32 }
  0xa1   :  { %758 = vtanh.f32 %v72_v33 }
  0xa6   :  { %v757_v34 = vpop.eup %756  ;;  %v84_v35 = vpop.f32.mrf.mxu2 }
  0xa7   :  { %v1001_v36 = vpop.f32.mrf.mxu3  ;;  %v759_v37 = vpop.eup %758  ;;  %760 = vtanh.f32 %v84_v35  ;;  %444 = vrot.lane.b32.xlu0 %v757_v34, %s884_s16  ;;  %v697_v1 = vmul.f32 -1.442695, %v84_v35 }
  0xa8   :  { %762 = vtanh.f32 %v1001_v36  ;;  %452 = vrot.lane.b32.xlu2 %v759_v37, %s884_s16  ;;  %v1006_v39 = vpop.f32.mrf.mxu0  ;;  %v75_v43 = vpop.f32.mrf.mxu1  ;;  %v701_v10 = vmul.f32 -1.442695, %v1001_v36 }
  0xa9   :  { %764 = vtanh.f32 %v1006_v39  ;;  %v694_v6 = vmul.f32 -1.442695, %v75_v43  ;;  %v690_v19 = vmul.f32 -1.442695, %v1006_v39 }
  0xad   :  { %v761_v38 = vpop.eup %760 }
  0xae   :  { %v763_v40 = vpop.eup %762  ;;  %v1008_v41 = vpop.f32.mrf.mxu2 }
  0xaf   :  { %v1010_v42 = vpop.f32.mrf.mxu3  ;;  %468 = vrot.lane.b32.xlu0 %v763_v40, %s884_s16  ;;  %v765_v44 = vpop.eup %764  ;;  %v698_v28 = vmul.f32 -1.442695, %v1008_v41 }
  0xb0   :  { %766 = vtanh.f32 %v1010_v42  ;;  %460 = vrot.lane.b32.xlu2 %v761_v38, %s884_s16  ;;  %v1021_v47 = vpop.f32.mrf.mxu0  ;;  %v1033_v53 = vpop.f32.mrf.mxu1  ;;  %v702_v22 = vmul.f32 -1.442695, %v1010_v42 }
  0xb1   :  { %768 = vtanh.f32 %v1008_v41  ;;  %v691_v33 = vmul.f32 -1.442695, %v1021_v47 }
  0xb2   :  { %770 = vtanh.f32 %v75_v43 }
  0xb3   :  { %772 = vtanh.f32 %v1021_v47 }
  0xb6   :  { %v767_v45 = vpop.eup %766  ;;  %v1017_v46 = vpop.f32.mrf.mxu2 }
  0xb7   :  { %470 = vrot.lane.b32.xlu1 %v767_v45, %s884_s16  ;;  %446 = vrot.lane.b32.xlu0 %v765_v44, %s884_s16  ;;  %v769_v48 = vpop.eup %768  ;;  %774 = vtanh.f32 %v1017_v46  ;;  %v1029_v52 = vpop.f32.mrf.mxu3 }
  0xb8   :  { %v771_v49 = vpop.eup %770  ;;  %v1038_v56 = vpop.f32.mrf.mxu0 }
  0xb9   :  { %454 = vrot.lane.b32.xlu2 %v771_v49, %s884_s16  ;;  %v773_v51 = vpop.eup %772  ;;  %v1046_v61 = vpop.f32.mrf.mxu1 }
  0xbd   :  { %v775_v54 = vpop.eup %774 }
  0xbe   :  { %v1026_v50 = vpop.f32.mrf.mxu2 }
  0xbf   :  { %776 = vtanh.f32 %v1026_v50  ;;  %462 = vrot.lane.b32.xlu0 %v769_v48, %s884_s16  ;;  %448 = vrot.lane.b32.xlu1 %v773_v51, %s884_s16  ;;  %v1042_v58 = vpop.f32.mrf.mxu3  ;;  %v700_v45 = vmul.f32 -1.442695, %v1026_v50 }
  0xc0   :  { %778 = vtanh.f32 %v1033_v53 }
  0xc1   :  { %780 = vtanh.f32 %v1029_v52 }
  0xc2   :  { %782 = vtanh.f32 %v1038_v56 }
  0xc3   :  { %784 = vtanh.f32 %v1042_v58 }
  0xc4   :  { %786 = vtanh.f32 %v1046_v61 }
  0xc5   :  { %v777_v55 = vpop.eup %776  ;;  %788 = vpow2.f32 %v693_v0  ;;  %v699_v0 = vmul.f32 -1.442695, %v1017_v46  ;;  %v695_v46 = vmul.f32 -1.442695, %v1033_v53 }
  0xc6   :  { %466 = vrot.lane.b32.xlu2 %v777_v55, %s884_s16  ;;  %v779_v57 = vpop.eup %778  ;;  %790 = vpow2.f32 %v697_v1 }
  0xc7   :  { %464 = vrot.lane.b32.xlu1 %v775_v54, %s884_s16  ;;  %456 = vrot.lane.b32.xlu0 %v779_v57, %s884_s16  ;;  %v781_v59 = vpop.eup %780 }
  0xc8   :  { %v783_v60 = vpop.eup %782 }
  0xc9   :  { %v785_v62 = vpop.eup %784 }
  0xca   :  { %v787_v63 = vpop.eup %786 }
  0xcb   :  { %v789_v2 = vpop.eup %788 }
  0xcc   :  { %v160_v3 = vadd.f32 1.0, %v789_v2  ;;  %v791_v4 = vpop.eup %790 }
  0xcd   :  { %v1053_v5 = vadd.f32 1.0, %v791_v4 }
  0xce   :  { %472 = vrot.lane.b32.xlu2 %v781_v59, %s884_s16  ;;  %792 = vrcp.f32 %v160_v3  ;;  %vm237_vm0 = vweird.f32 %v160_v3  ;;  %v241_v20 = vand.u32 2147483647, %v160_v3  ;;  %v243_v21 = vand.u32 2147483648, %v160_v3 }
  0xcf   :  { %450 = vrot.lane.b32.xlu1 %v783_v60, %s884_s16  ;;  %474 = vrot.lane.b32.xlu0 %v785_v62, %s884_s16  ;;  %794 = vrcp.f32 %v1053_v5  ;;  %vm297_vm4 = vweird.f32 %v1053_v5  ;;  %v303_v36 = vand.u32 2147483648, %v1053_v5  ;;  %v301_v40 = vand.u32 2147483647, %v1053_v5 }
  0xd0   :  { %796 = vpow2.f32 %v694_v6  ;;  %vm242_vm3 = vcmp.eq.f32.partialorder %v241_v20, 8.507059e+37  ;;  %v244_v27 = vor.u32 1.1754944e-38, %v243_v21 }
  0xd1   :  { %798 = vpow2.f32 %v689_v8  ;;  %v304_v47 = vor.u32 1.1754944e-38, %v303_v36  ;;  %vm302_vm7 = vcmp.eq.f32.partialorder %v301_v40, 8.507059e+37 }
  0xd2   :  { %800 = vpow2.f32 %v701_v10 }
  0xd4   :  { %v793_v7 = vpop.eup %792 }
  0xd5   :  { %v233_v9 = vmul.f32 %v793_v7, %v160_v3  ;;  %v795_v12 = vpop.eup %794  ;;  %vm238_vm1 = vweird.f32 %v793_v7 }
  0xd6   :  { %v797_v13 = vpop.eup %796  ;;  %v293_v16 = vmul.f32 %v795_v12, %v1053_v5  ;;  %vm1066_vm2 = vmor %vm237_vm0, %vm238_vm1  ;;  %vm298_vm5 = vweird.f32 %v795_v12 }
  0xd7   :  { %458 = vrot.lane.b32.xlu1 %v787_v63, %s884_s16  ;;  %v234_v11 = vsub.f32 1.0, %v233_v9  ;;  %v799_v14 = vpop.eup %798  ;;  %v1059_v17 = vadd.f32 1.0, %v797_v13  ;;  %vm1088_vm6 = vmor %vm297_vm4, %vm298_vm5 }
  0xd8   :  { %v1061_v18 = vadd.f32 1.0, %v799_v14  ;;  %v294_v24 = vsub.f32 1.0, %v293_v16  ;;  %v801_v26 = vpop.eup %800 }
  0xd9   :  { %v235_v15 = vmul.f32 %v793_v7, %v234_v11  ;;  %802 = vrcp.f32 %v1059_v17  ;;  %v1074_v31 = vadd.f32 1.0, %v801_v26  ;;  %vm252_vm8 = vweird.f32 %v1059_v17 }
  0xda   :  { %804 = vrcp.f32 %v1061_v18  ;;  %v295_v30 = vmul.f32 %v795_v12, %v294_v24  ;;  %v258_v9 = vand.u32 2147483648, %v1059_v17  ;;  %v181_v10 = vand.u32 2147483647, %v1061_v18 }
  0xdb   :  { %v236_v23 = vadd.f32 %v793_v7, %v235_v15  ;;  %806 = vpow2.f32 %v690_v19  ;;  %v256_v13 = vand.u32 2147483647, %v1059_v17  ;;  %vm177_vm10 = vweird.f32 %v1061_v18 }
  0xdc   :  { %808 = vpow2.f32 %v702_v22  ;;  %v296_v39 = vadd.f32 %v795_v12, %v295_v30  ;;  %v703_v15 = vmul.f32 -1.442695, %v1029_v52  ;;  %v692_v22 = vmul.f32 -1.442695, %v1038_v56 }
  0xdd   :  { %v240_v29 = vsel %vm1066_vm2, %v793_v7, %v236_v23  ;;  %810 = vpow2.f32 %v698_v28  ;;  %v259_v23 = vor.u32 1.1754944e-38, %v258_v9  ;;  %vm1146_vm13 = vcmp.eq.f32.partialorder %v181_v10, 8.507059e+37 }
  0xde   :  { %v1080_v35 = vsel %vm242_vm3, %v244_v27, %v240_v29  ;;  %812 = vrcp.f32 %v1074_v31  ;;  %v300_v51 = vsel %vm1088_vm6, %v795_v12, %v296_v39  ;;  %vm1153_vm14 = vcmp.eq.f32.partialorder %v256_v13, 8.507059e+37 }
  0xdf   :  { %v1077_v32 = vpop.eup %802  ;;  %v1105_v60 = vsel %vm302_vm7, %v304_v47, %v300_v51  ;;  %v704_v29 = vmul.f32 -1.442695, %v1042_v58  ;;  %v696_v47 = vmul.f32 -1.442695, %v1046_v61  ;;  %vm357_vm1 = vweird.f32 %v1074_v31 }
  0xe0   :  { %v1083_v37 = vpop.eup %804  ;;  %v248_v44 = vmul.f32 %v1077_v32, %v1059_v17  ;;  %vm253_vm9 = vweird.f32 %v1077_v32  ;;  %v183_v17 = vand.u32 2147483648, %v1061_v18 }
  0xe1   :  { %v807_v41 = vpop.eup %806  ;;  %v173_v48 = vmul.f32 %v1083_v37, %v1061_v18  ;;  %vm1134_vm11 = vmor %vm252_vm8, %vm253_vm9  ;;  %vm178_vm12 = vweird.f32 %v1083_v37 }
  0xe2   :  { %v809_v43 = vpop.eup %808  ;;  %v1097_v49 = vadd.f32 1.0, %v807_v41  ;;  %v249_v57 = vsub.f32 1.0, %v248_v44  ;;  %vm1159_vm15 = vmor %vm177_vm10, %vm178_vm12  ;;  %v184_v18 = vor.u32 1.1754944e-38, %v183_v17 }
  0xe3   :  { %v1101_v54 = vadd.f32 1.0, %v809_v43  ;;  %v811_v55 = vpop.eup %810  ;;  %v174_v62 = vsub.f32 1.0, %v173_v48 }
  0xe4   :  { %v1103_v59 = vpop.eup %812  ;;  %v250_v3 = vmul.f32 %v1077_v32, %v249_v57  ;;  %v1115_v5 = vadd.f32 1.0, %v811_v55  ;;  %vm192_vm6 = vweird.f32 %v1097_v49  ;;  %v198_v26 = vand.u32 2147483648, %v1097_v49 }
  0xe5   :  { %v353_v4 = vmul.f32 %v1103_v59, %v1074_v31  ;;  %v175_v6 = vmul.f32 %v1083_v37, %v174_v62  ;;  %vm358_vm0 = vweird.f32 %v1103_v59  ;;  %vm372_vm4 = vweird.f32 %v1101_v54 }
  0xe6   :  { %v251_v12 = vadd.f32 %v1077_v32, %v250_v3  ;;  %vm1199_vm2 = vmor %vm357_vm1, %vm358_vm0  ;;  %v376_v3 = vand.u32 2147483647, %v1101_v54  ;;  %vm312_vm0 = vweird.f32 %v1115_v5 }
  0xe7   :  { %v354_v53 = vsub.f32 1.0, %v353_v4  ;;  %v176_v19 = vadd.f32 %v1083_v37, %v175_v6 }
  0xe8   :  { %v255_v25 = vsel %vm1134_vm11, %v1077_v32, %v251_v12  ;;  %vm1239_vm8 = vcmp.eq.f32.partialorder %v376_v3, 8.507059e+37 }
  0xe9   :  { %v355_v27 = vmul.f32 %v1103_v59, %v354_v53  ;;  %v180_v30 = vsel %vm1159_vm15, %v1083_v37, %v176_v19  ;;  %v1181_v39 = vsel %vm1153_vm14, %v259_v23, %v255_v25  ;;  %v196_v23 = vand.u32 2147483647, %v1097_v49 }
  0xea   :  { %v1187_v42 = vsel %vm1146_vm13, %v184_v18, %v180_v30 }
  0xeb   :  { %v356_v43 = vadd.f32 %v1103_v59, %v355_v27  ;;  %vm197_vm13 = vcmp.eq.f32.partialorder %v196_v23, 8.507059e+37 }
 0x102   :  { %v453_v34 = vpop.permute.xlu2 %452 }
 0x103   :  { %v496_v38 = vmul.f32 %v453_v34, %v1080_v35  ;;  %v363_v34 = vand.u32 2147483648, %v1074_v31 }
 0x105   :  { %814 = vtanh.f32 %v496_v38  ;;  %v364_v61 = vor.u32 1.1754944e-38, %v363_v34 }
 0x106   :  { %816 = vpow2.f32 %v691_v33  ;;  %v361_v33 = vand.u32 2147483647, %v1074_v31  ;;  %v360_v31 = vsel %vm1199_vm2, %v1103_v59, %v356_v43  ;;  %v378_v59 = vand.u32 2147483648, %v1101_v54 }
 0x107   :  { %818 = vpow2.f32 %v700_v45 }
 0x108   :  { %820 = vrcp.f32 %v1097_v49  ;;  %vm1203_vm3 = vcmp.eq.f32.partialorder %v361_v33, 8.507059e+37  ;;  %v379_v25 = vor.u32 1.1754944e-38, %v378_v59 }
 0x109   :  { %822 = vrcp.f32 %v1101_v54  ;;  %v1230_v10 = vsel %vm1203_vm3, %v364_v61, %v360_v31 }
 0x10a   :  { %v461_v50 = vpop.permute.xlu2 %460 }
 0x10b   :  { %v815_v63 = vpop.eup %814  ;;  %v500_v1 = vmul.f32 %v461_v50, %v1105_v60 }
 0x10c   :  { %548 = vrot.lane.b32.xlu2 %v815_v63, %s885_s0  ;;  %v817_v2 = vpop.eup %816 }
 0x10d   :  { %824 = vtanh.f32 %v500_v1  ;;  %v819_v7 = vpop.eup %818  ;;  %v1121_v8 = vadd.f32 1.0, %v817_v2 }
 0x10e   :  { %826 = vpow2.f32 %v699_v0  ;;  %v1125_v11 = vpop.eup %820  ;;  %v1140_v21 = vadd.f32 1.0, %v819_v7 }
 0x10f   :  { %v1130_v14 = vpop.eup %822  ;;  %828 = vrcp.f32 %v1115_v5  ;;  %v188_v32 = vmul.f32 %v1125_v11, %v1097_v49  ;;  %vm193_vm7 = vweird.f32 %v1125_v11  ;;  %v199_v49 = vor.u32 1.1754944e-38, %v198_v26 }
 0x110   :  { %830 = vpow2.f32 %v695_v46  ;;  %v368_v28 = vmul.f32 %v1130_v14, %v1101_v54  ;;  %vm373_vm5 = vweird.f32 %v1130_v14  ;;  %vm342_vm9 = vweird.f32 %v1140_v21  ;;  %vm1271_vm11 = vmor %vm192_vm6, %vm193_vm7 }
 0x111   :  { %832 = vrcp.f32 %v1121_v8  ;;  %v189_v51 = vsub.f32 1.0, %v188_v32  ;;  %vm1257_vm10 = vmor %vm372_vm4, %vm373_vm5  ;;  %vm207_vm14 = vweird.f32 %v1121_v8  ;;  %v213_v61 = vand.u32 2147483648, %v1121_v8 }
 0x112   :  { %834 = vpow2.f32 %v703_v15  ;;  %v369_v44 = vsub.f32 1.0, %v368_v28  ;;  %v346_v28 = vand.u32 2147483647, %v1140_v21 }
 0x113   :  { %v825_v20 = vpop.eup %824  ;;  %836 = vrcp.f32 %v1140_v21  ;;  %v455_v58 = vpop.permute.xlu2 %454  ;;  %v190_v4 = vmul.f32 %v1125_v11, %v189_v51  ;;  %v318_v51 = vand.u32 2147483648, %v1115_v5 }
 0x114   :  { %556 = vrot.lane.b32.xlu0 %v825_v20, %s885_s0  ;;  %v827_v24 = vpop.eup %826  ;;  %838 = vpow2.f32 %v692_v22  ;;  %v497_v40 = vmul.f32 %v455_v58, %v1181_v39  ;;  %v370_v0 = vmul.f32 %v1130_v14, %v369_v44  ;;  %vm1306_vm2 = vcmp.eq.f32.partialorder %v346_v28, 8.507059e+37 }
 0x115   :  { %v1175_v36 = vpop.eup %828  ;;  %v1177_v38 = vadd.f32 1.0, %v827_v24  ;;  %840 = vpow2.f32 %v704_v29  ;;  %v191_v22 = vadd.f32 %v1125_v11, %v190_v4  ;;  %v348_v29 = vand.u32 2147483648, %v1140_v21 }
 0x116   :  { %v831_v37 = vpop.eup %830  ;;  %842 = vtanh.f32 %v497_v40  ;;  %v308_v6 = vmul.f32 %v1175_v36, %v1115_v5  ;;  %v371_v15 = vadd.f32 %v1130_v14, %v370_v0  ;;  %vm313_vm1 = vweird.f32 %v1175_v36 }
 0x117   :  { %v1190_v45 = vpop.eup %832  ;;  %v1195_v57 = vadd.f32 1.0, %v831_v37  ;;  %v195_v58 = vsel %vm1271_vm11, %v1125_v11, %v191_v22  ;;  %v316_v0 = vand.u32 2147483647, %v1115_v5  ;;  %v211_v4 = vand.u32 2147483647, %v1121_v8  ;;  %vm1320_vm3 = vmor %vm312_vm0, %vm313_vm1 }
 0x118   :  { %v835_v55 = vpop.eup %834  ;;  %v203_v1 = vmul.f32 %v1190_v45, %v1121_v8  ;;  %v309_v52 = vsub.f32 1.0, %v308_v6  ;;  %v375_v18 = vsel %vm1257_vm10, %v1130_v14, %v371_v15  ;;  %vm208_vm15 = vweird.f32 %v1190_v45 }
 0x119   :  { %v445_v41 = vpop.permute.xlu0 %444  ;;  %v1207_v63 = vpop.eup %836  ;;  %v1220_v46 = vadd.f32 1.0, %v835_v55  ;;  %v1312_v3 = vsel %vm1239_vm8, %v379_v25, %v375_v18  ;;  %vm1332_vm4 = vmor %vm207_vm14, %vm208_vm15  ;;  %v214_v8 = vor.u32 1.1754944e-38, %v213_v61  ;;  %vm317_vm6 = vcmp.eq.f32.partialorder %v316_v0, 8.507059e+37 }
 0x11a   :  { %v492_v48 = vmul.f32 %v445_v41, %v1187_v42  ;;  %v839_v2 = vpop.eup %838  ;;  %v338_v9 = vmul.f32 %v1207_v63, %v1140_v21  ;;  %v204_v16 = vsub.f32 1.0, %v203_v1  ;;  %vm343_vm12 = vweird.f32 %v1207_v63 }
 0x11b   :  { %v841_v7 = vpop.eup %840  ;;  %v1233_v13 = vadd.f32 1.0, %v839_v2  ;;  %v310_v14 = vmul.f32 %v1175_v36, %v309_v52  ;;  %vm1340_vm5 = vmor %vm342_vm9, %vm343_vm12  ;;  %vm212_vm7 = vcmp.eq.f32.partialorder %v211_v4, 8.507059e+37  ;;  %vm327_vm8 = vweird.f32 %v1177_v38 }
 0x11c   :  { %844 = vtanh.f32 %v492_v48  ;;  %v843_v12 = vpop.eup %842  ;;  %v339_v27 = vsub.f32 1.0, %v338_v9  ;;  %v1262_v32 = vadd.f32 1.0, %v841_v7  ;;  %v205_v54 = vmul.f32 %v1190_v45, %v204_v16 }
 0x11d   :  { %846 = vrcp.f32 %v1177_v38  ;;  %550 = vrot.lane.b32.xlu0 %v843_v12, %s885_s0  ;;  %v311_v31 = vadd.f32 %v1175_v36, %v310_v14  ;;  %v349_v9 = vor.u32 1.1754944e-38, %v348_v29  ;;  %v319_v16 = vor.u32 1.1754944e-38, %v318_v51 }
 0x11e   :  { %848 = vpow2.f32 %v696_v47  ;;  %v340_v41 = vmul.f32 %v1207_v63, %v339_v27  ;;  %v1294_v47 = vsel %vm197_vm13, %v199_v49, %v195_v58  ;;  %v206_v48 = vadd.f32 %v1190_v45, %v205_v54 }
 0x11f   :  { %850 = vrcp.f32 %v1195_v57  ;;  %v331_v26 = vand.u32 2147483647, %v1177_v38  ;;  %vm267_vm10 = vweird.f32 %v1195_v57  ;;  %vm387_vm12 = vweird.f32 %v1220_v46 }
 0x120   :  { %852 = vrcp.f32 %v1220_v46  ;;  %v341_v7 = vadd.f32 %v1207_v63, %v340_v41  ;;  %v210_v15 = vsel %vm1332_vm4, %v1190_v45, %v206_v48  ;;  %v467_v14 = vpop.permute.xlu2 %466  ;;  %v273_v41 = vand.u32 2147483648, %v1195_v57 }
 0x121   :  { %v469_v53 = vpop.permute.xlu0 %468  ;;  %v1358_v52 = vsel %vm212_vm7, %v214_v8, %v210_v15  ;;  %v271_v48 = vand.u32 2147483647, %v1195_v57  ;;  %vm1396_vm15 = vcmp.eq.f32.partialorder %v331_v26, 8.507059e+37  ;;  %v393_v4 = vand.u32 2147483648, %v1220_v46 }
 0x122   :  { %v845_v19 = vpop.eup %844  ;;  %v504_v20 = vmul.f32 %v469_v53, %v1230_v10  ;;  %v345_v45 = vsel %vm1340_vm5, %v1207_v63, %v341_v7  ;;  %v333_v63 = vand.u32 2147483648, %v1177_v38  ;;  %v274_v6 = vor.u32 1.1754944e-38, %v273_v41 }
 0x123   :  { %v1245_v24 = vpop.eup %846  ;;  %540 = vrot.lane.b32.xlu1 %v845_v19, %s885_s0  ;;  %v1393_v51 = vsel %vm1306_vm2, %v349_v9, %v345_v45  ;;  %vm1422_vm1 = vcmp.eq.f32.partialorder %v271_v48, 8.507059e+37  ;;  %vm222_vm2 = vweird.f32 %v1233_v13  ;;  %v226_v5 = vand.u32 2147483647, %v1233_v13 }
 0x124   :  { %v849_v56 = vpop.eup %848  ;;  %854 = vtanh.f32 %v504_v20  ;;  %v323_v40 = vmul.f32 %v1245_v24, %v1177_v38  ;;  %v315_v20 = vsel %vm1320_vm3, %v1175_v36, %v311_v31  ;;  %vm328_vm9 = vweird.f32 %v1245_v24 }
 0x125   :  { %856 = vrcp.f32 %v1233_v13  ;;  %v1276_v34 = vpop.eup %850  ;;  %v1283_v37 = vadd.f32 1.0, %v849_v56  ;;  %v1361_v25 = vsel %vm317_vm6, %v319_v16, %v315_v20  ;;  %vm1383_vm13 = vmor %vm327_vm8, %vm328_vm9  ;;  %v503_v2 = vmul.f32 %v467_v14, %v1393_v51 }
 0x126   :  { %v1292_v11 = vpop.eup %852  ;;  %v263_v55 = vmul.f32 %v1276_v34, %v1195_v57  ;;  %v324_v59 = vsub.f32 1.0, %v323_v40  ;;  %858 = vrcp.f32 %v1262_v32  ;;  %vm268_vm11 = vweird.f32 %v1276_v34 }
 0x127   :  { %v383_v12 = vmul.f32 %v1292_v11, %v1220_v46  ;;  %vm388_vm14 = vweird.f32 %v1292_v11  ;;  %vm1404_vm0 = vmor %vm267_vm10, %vm268_vm11  ;;  %v228_v15 = vand.u32 2147483648, %v1233_v13  ;;  %vm227_vm7 = vcmp.eq.f32.partialorder %v226_v5, 8.507059e+37 }
 0x128   :  { %v264_v19 = vsub.f32 1.0, %v263_v55  ;;  %v325_v17 = vmul.f32 %v1245_v24, %v324_v59  ;;  %v334_v55 = vor.u32 1.1754944e-38, %v333_v63  ;;  %vm1432_vm4 = vmor %vm387_vm12, %vm388_vm14  ;;  %v473_v26 = vpop.permute.xlu2 %472  ;;  %vm402_vm8 = vweird.f32 %v1262_v32 }
 0x129   :  { %v471_v43 = vpop.permute.xlu1 %470  ;;  %v447_v44 = vpop.permute.xlu0 %446  ;;  %v384_v23 = vsub.f32 1.0, %v383_v12  ;;  %vm282_vm10 = vweird.f32 %v1283_v37  ;;  %v288_v14 = vand.u32 2147483648, %v1283_v37  ;;  %v286_v48 = vand.u32 2147483647, %v1283_v37 }
 0x12a   :  { %v855_v50 = vpop.eup %854  ;;  %v493_v62 = vmul.f32 %v447_v44, %v1294_v47  ;;  %v505_v21 = vmul.f32 %v471_v43, %v1312_v3  ;;  %v265_v56 = vmul.f32 %v1276_v34, %v264_v19  ;;  %v326_v33 = vadd.f32 %v1245_v24, %v325_v17 }
 0x12b   :  { %v1304_v1 = vpop.eup %856  ;;  %564 = vrot.lane.b32.xlu1 %v855_v50, %s885_s0  ;;  %v385_v49 = vmul.f32 %v1292_v11, %v384_v23  ;;  %v391_v43 = vand.u32 2147483647, %v1220_v46 }
 0x12c   :  { %860 = vtanh.f32 %v493_v62  ;;  %v218_v22 = vmul.f32 %v1304_v1, %v1233_v13  ;;  %v1366_v27 = vpop.eup %858  ;;  %v266_v44 = vadd.f32 %v1276_v34, %v265_v56  ;;  %v330_v62 = vsel %vm1383_vm13, %v1245_v24, %v326_v33 }
 0x12d   :  { %862 = vrcp.f32 %v1283_v37  ;;  %v398_v31 = vmul.f32 %v1366_v27, %v1262_v32  ;;  %v386_v57 = vadd.f32 %v1292_v11, %v385_v49  ;;  %vm223_vm3 = vweird.f32 %v1304_v1 }
 0x12e   :  { %864 = vtanh.f32 %v505_v21  ;;  %v219_v54 = vsub.f32 1.0, %v218_v22  ;;  %v270_v24 = vsel %vm1404_vm0, %v1276_v34, %v266_v44  ;;  %v1438_v34 = vsel %vm1396_vm15, %v334_v55, %v330_v62  ;;  %vm1455_vm5 = vmor %vm222_vm2, %vm223_vm3 }
 0x12f   :  { %v399_v8 = vsub.f32 1.0, %v398_v31  ;;  %v394_v21 = vor.u32 1.1754944e-38, %v393_v4  ;;  %v1447_v17 = vsel %vm1422_vm1, %v274_v6, %v270_v24  ;;  %v390_v23 = vsel %vm1432_vm4, %v1292_v11, %v386_v57 }
 0x130   :  { %v220_v61 = vmul.f32 %v1304_v1, %v219_v54  ;;  %vm392_vm6 = vcmp.eq.f32.partialorder %v391_v43, 8.507059e+37  ;;  %v229_v56 = vor.u32 1.1754944e-38, %v228_v15  ;;  %vm403_vm9 = vweird.f32 %v1366_v27 }
 0x131   :  { %v463_v36 = vpop.permute.xlu0 %462  ;;  %v449_v28 = vpop.permute.xlu1 %448  ;;  %v1468_v63 = vsel %vm392_vm6, %v394_v21, %v390_v23  ;;  %v408_v54 = vand.u32 2147483648, %v1262_v32  ;;  %vm1482_vm12 = vmor %vm402_vm8, %vm403_vm9  ;;  %v289_v55 = vor.u32 1.1754944e-38, %v288_v14  ;;  %vm287_vm15 = vcmp.eq.f32.partialorder %v286_v48, 8.507059e+37 }
 0x132   :  { %v501_v29 = vmul.f32 %v463_v36, %v1361_v25  ;;  %v861_v30 = vpop.eup %860  ;;  %v494_v18 = vmul.f32 %v449_v28, %v1358_v52  ;;  %v221_v46 = vadd.f32 %v1304_v1, %v220_v61  ;;  %v400_v28 = vmul.f32 %v1366_v27, %v399_v8 }
 0x133   :  { %v1374_v58 = vpop.eup %862  ;;  %542 = vrot.lane.b32.xlu2 %v861_v30, %s885_s0  ;;  %v506_v11 = vmul.f32 %v473_v26, %v1468_v63  ;;  %v409_v38 = vor.u32 1.1754944e-38, %v408_v54  ;;  %vm668_vm0 = vcmask 7168  }
 0x134   :  { %866 = vtanh.f32 %v501_v29  ;;  %v278_v0 = vmul.f32 %v1374_v58, %v1283_v37  ;;  %v865_v59 = vpop.eup %864  ;;  %v225_v13 = vsel %vm1455_vm5, %v1304_v1, %v221_v46  ;;  %vm283_vm11 = vweird.f32 %v1374_v58 }
 0x135   :  { %868 = vtanh.f32 %v494_v18  ;;  %v1475_v33 = vsel %vm227_vm7, %v229_v56, %v225_v13  ;;  %v406_v1 = vand.u32 2147483647, %v1262_v32  ;;  %v401_v41 = vadd.f32 %v1366_v27, %v400_v28  ;;  %vm284_vm13 = vmor %vm282_vm10, %vm283_vm11 }
 0x136   :  { %v279_v20 = vsub.f32 1.0, %v278_v0  ;;  %870 = vtanh.f32 %v503_v2 }
 0x137   :  { %vm407_vm14 = vcmp.eq.f32.partialorder %v406_v1, 8.507059e+37  ;;  %v405_v50 = vsel %vm1482_vm12, %v1366_v27, %v401_v41 }
 0x138   :  { %v280_v29 = vmul.f32 %v1374_v58, %v279_v20  ;;  %v410_v31 = vsel %vm407_vm14, %v409_v38, %v405_v50 }
 0x139   :  { %v465_v53 = vpop.permute.xlu1 %464  ;;  %v457_v22 = vpop.permute.xlu0 %456 }
 0x13a   :  { %v867_v9 = vpop.eup %866  ;;  %v502_v19 = vmul.f32 %v465_v53, %v1438_v34  ;;  %v498_v36 = vmul.f32 %v457_v22, %v1447_v17  ;;  %v281_v44 = vadd.f32 %v1374_v58, %v280_v29 }
 0x13b   :  { %v869_v16 = vpop.eup %868  ;;  %558 = vrot.lane.b32.xlu1 %v867_v9, %s885_s0  ;;  %566 = vrot.lane.b32.xlu2 %v865_v59, %s885_s0 }
 0x13c   :  { %544 = vrot.lane.b32.xlu0 %v869_v16, %s885_s0  ;;  %872 = vtanh.f32 %v502_v19  ;;  %v871_v30 = vpop.eup %870  ;;  %v285_v62 = vsel %vm284_vm13, %v1374_v58, %v281_v44 }
 0x13d   :  { %874 = vtanh.f32 %v498_v36  ;;  %v290_v0 = vsel %vm287_vm15, %v289_v55, %v285_v62 }
 0x13e   :  { %876 = vtanh.f32 %v506_v11 }
 0x141   :  { %v451_v18 = vpop.permute.xlu1 %450  ;;  %v475_v61 = vpop.permute.xlu0 %474 }
 0x142   :  { %v873_v49 = vpop.eup %872  ;;  %v495_v40 = vmul.f32 %v451_v18, %v1475_v33  ;;  %v507_v57 = vmul.f32 %v475_v61, %v410_v31 }
 0x143   :  { %560 = vrot.lane.b32.xlu2 %v873_v49, %s885_s0  ;;  %v875_v32 = vpop.eup %874 }
 0x144   :  { %562 = vrot.lane.b32.xlu0 %v871_v30, %s885_s0  ;;  %552 = vrot.lane.b32.xlu1 %v875_v32, %s885_s0  ;;  %878 = vtanh.f32 %v495_v40  ;;  %v877_v2 = vpop.eup %876 }
 0x149   :  { %v459_v37 = vpop.permute.xlu1 %458 }
 0x14a   :  { %v499_v4 = vmul.f32 %v459_v37, %v290_v0  ;;  %v879_v6 = vpop.eup %878 }
 0x14c   :  { %568 = vrot.lane.b32.xlu0 %v877_v2, %s885_s0  ;;  %880 = vtanh.f32 %v499_v4  ;;  %546 = vrot.lane.b32.xlu1 %v879_v6, %s885_s0 }
 0x14d   :  { %882 = vtanh.f32 %v507_v57 }
 0x152   :  { %v881_v59 = vpop.eup %880 }
 0x153   :  { %554 = vrot.lane.b32.xlu2 %v881_v59, %s885_s0  ;;  %v883_v27 = vpop.eup %882 }
 0x154   :  { %570 = vrot.lane.b32.xlu1 %v883_v27, %s885_s0 }
 0x166   :  { %v549_v58 = vpop.permute.xlu2 %548 }
 0x167   :  { %v592_v24 = vmul.f32 %v549_v58, %v1080_v35 }
 0x169   :  { %628 = vrot.lane.b32.xlu0 %v592_v24, %s886_s17 }
 0x186   :  { %v557_v7 = vpop.permute.xlu0 %556 }
 0x187   :  { %v596_v9 = vmul.f32 %v557_v7, %v1105_v60 }
 0x189   :  { %636 = vrot.lane.b32.xlu1 %v596_v9, %s886_s17 }
 0x18d   :  { %v543_v12 = vpop.permute.xlu2 %542 }
 0x18e   :  { %v589_v53 = vmul.f32 %v543_v12, %v1294_v47 }
 0x18f   :  { %v551_v5 = vpop.permute.xlu0 %550 }
 0x190   :  { %622 = vrot.lane.b32.xlu0 %v589_v53, %s886_s17  ;;  %v593_v15 = vmul.f32 %v551_v5, %v1181_v39 }
 0x192   :  { %630 = vrot.lane.b32.xlu1 %v593_v15, %s886_s17 }
 0x195   :  { %v541_v16 = vpop.permute.xlu1 %540  ;;  %v567_v19 = vpop.permute.xlu2 %566 }
 0x196   :  { %v588_v35 = vmul.f32 %v541_v16, %v1187_v42 }
 0x198   :  { %620 = vrot.lane.b32.xlu2 %v588_v35, %s886_s17 }
 0x19d   :  { %v565_v46 = vpop.permute.xlu1 %564  ;;  %v561_v60 = vpop.permute.xlu2 %560 }
 0x19e   :  { %v600_v8 = vmul.f32 %v565_v46, %v1230_v10  ;;  %v598_v20 = vmul.f32 %v561_v60, %v1438_v34  ;;  %v601_v34 = vmul.f32 %v567_v19, %v1312_v3 }
 0x1a0   :  { %644 = vrot.lane.b32.xlu2 %v600_v8, %s886_s17  ;;  %640 = vrot.lane.b32.xlu0 %v598_v20, %s886_s17 }
 0x1ad   :  { %v559_v47 = vpop.permute.xlu1 %558  ;;  %v555_v21 = vpop.permute.xlu2 %554 }
 0x1ae   :  { %v545_v39 = vpop.permute.xlu0 %544  ;;  %v597_v22 = vmul.f32 %v559_v47, %v1361_v25  ;;  %v595_v45 = vmul.f32 %v555_v21, %v290_v0 }
 0x1af   :  { %v590_v42 = vmul.f32 %v545_v39, %v1358_v52 }
 0x1b0   :  { %638 = vrot.lane.b32.xlu2 %v597_v22, %s886_s17  ;;  %634 = vrot.lane.b32.xlu0 %v595_v45, %s886_s17 }
 0x1b1   :  { %624 = vrot.lane.b32.xlu1 %v590_v42, %s886_s17 }
 0x1b6   :  { %v563_v10 = vpop.permute.xlu0 %562  ;;  %v553_v36 = vpop.permute.xlu1 %552 }
 0x1b7   :  { %v599_v23 = vmul.f32 %v563_v10, %v1393_v51  ;;  %v594_v26 = vmul.f32 %v553_v36, %v1447_v17 }
 0x1b8   :  { %646 = vrot.lane.b32.xlu0 %v601_v34, %s886_s17 }
 0x1b9   :  { %642 = vrot.lane.b32.xlu1 %v599_v23, %s886_s17  ;;  %632 = vrot.lane.b32.xlu2 %v594_v26, %s886_s17 }
 0x1be   :  { %v569_v52 = vpop.permute.xlu0 %568  ;;  %v547_v56 = vpop.permute.xlu1 %546 }
 0x1bf   :  { %v602_v25 = vmul.f32 %v569_v52, %v1468_v63  ;;  %v591_v13 = vmul.f32 %v547_v56, %v1475_v33 }
 0x1c1   :  { %648 = vrot.lane.b32.xlu1 %v602_v25, %s886_s17  ;;  %626 = vrot.lane.b32.xlu2 %v591_v13, %s886_s17 }
 0x1c6   :  { %v571_v3 = vpop.permute.xlu1 %570 }
 0x1c7   :  { %v603_v51 = vmul.f32 %v571_v3, %v410_v31 }
 0x1c9   :  { %650 = vrot.lane.b32.xlu2 %v603_v51, %s886_s17 }
 0x1db   :  { %v629_v17 = vpop.permute.xlu0 %628 }
 0x1dc   :  { %673 = vst.msk [vmem:[%s1599_s2 + $0x20] sm:$0xff] %vm668_vm0, %v629_v17 }
 0x1f2   :  { %v621_v28 = vpop.permute.xlu2 %620 }
 0x1f3   :  { %669 = vst.msk [vmem:[%s1599_s2] sm:$0xff] %vm668_vm0, %v621_v28 }
 0x1fa   :  { %v645_v29 = vpop.permute.xlu2 %644 }
 0x1fb   :  { %681 = vst.msk [vmem:[%s1599_s2 + $0x60] sm:$0xff] %vm668_vm0, %v645_v29  ;;  %v637_v63 = vpop.permute.xlu1 %636 }
 0x1fc   :  { %677 = vst.msk [vmem:[%s1599_s2 + $0x40] sm:$0xff] %vm668_vm0, %v637_v63 }
 0x202   :  { %v623_v11 = vpop.permute.xlu0 %622 }
 0x203   :  { %670 = vst.msk [vmem:[%s1599_s2 + $0x8] sm:$0xff] %vm668_vm0, %v623_v11 }
 0x204   :  { %v631_v30 = vpop.permute.xlu1 %630 }
 0x205   :  { %674 = vst.msk [vmem:[%s1599_s2 + $0x28] sm:$0xff] %vm668_vm0, %v631_v30 }
 0x20a   :  { %v639_v18 = vpop.permute.xlu2 %638 }
 0x20b   :  { %678 = vst.msk [vmem:[%s1599_s2 + $0x48] sm:$0xff] %vm668_vm0, %v639_v18 }
 0x212   :  { %v641_v33 = vpop.permute.xlu0 %640 }
 0x213   :  { %679 = vst.msk [vmem:[%s1599_s2 + $0x50] sm:$0xff] %vm668_vm0, %v641_v33  ;;  %v633_v1 = vpop.permute.xlu2 %632 }
 0x214   :  { %675 = vst.msk [vmem:[%s1599_s2 + $0x30] sm:$0xff] %vm668_vm0, %v633_v1 }
 0x21b   :  { %v627_v54 = vpop.permute.xlu2 %626 }
 0x21c   :  { %672 = vst.msk [vmem:[%s1599_s2 + $0x18] sm:$0xff] %vm668_vm0, %v627_v54 }
 0x222   :  { %v635_v14 = vpop.permute.xlu0 %634 }
 0x223   :  { %v625_v49 = vpop.permute.xlu1 %624  ;;  %676 = vst.msk [vmem:[%s1599_s2 + $0x38] sm:$0xff] %vm668_vm0, %v635_v14  ;;  %v651_v40 = vpop.permute.xlu2 %650 }
 0x224   :  { %671 = vst.msk [vmem:[%s1599_s2 + $0x10] sm:$0xff] %vm668_vm0, %v625_v49 }
 0x225   :  { %684 = vst.msk [vmem:[%s1599_s2 + $0x78] sm:$0xff] %vm668_vm0, %v651_v40 }
 0x22a   :  { %v647_v41 = vpop.permute.xlu0 %646 }
 0x22b   :  { %v643_v43 = vpop.permute.xlu1 %642  ;;  %682 = vst.msk [vmem:[%s1599_s2 + $0x68] sm:$0xff] %vm668_vm0, %v647_v41 }
 0x22c   :  { %680 = vst.msk [vmem:[%s1599_s2 + $0x58] sm:$0xff] %vm668_vm0, %v643_v43 }
 0x233   :  { %v649_v44 = vpop.permute.xlu1 %648 }
 0x234   :  { %683 = vst.msk [vmem:[%s1599_s2 + $0x70] sm:$0xff] %vm668_vm0, %v649_v44 }

</bundles_post_ra>
